<compile_context>
chip_gen: v5e
topology: v5e:2x2
jax: 0.10.0
libtpu: 0.0.40
codegen_flags: <defaults>
</compile_context>

<pallas_src>
import functools

import jax
import jax.numpy as jnp
from jax.experimental import pallas as pl
from jax.experimental.pallas import tpu as pltpu

_SQRT_HALF = 0.7071067811865476


def _gelu_exact(x):
    # Matches torch.nn.GELU() default (exact, erf-based), computed in f32.
    return 0.5 * x * (1.0 + jax.lax.erf(x * _SQRT_HALF))


def _round_up(x, m):
    return (x + m - 1) // m * m


def _make_mlp_kernel(chunks, fc2_in_dtype):
    """chunks: static tuple of (offset, size) slabs over the padded hidden dim."""

    def kernel(x_ref, w1_ref, b1_ref, w2_ref, b2_ref, o_ref, acc_ref):
        for idx, (lo, sz) in enumerate(chunks):
            # fc1 partial: (TM, Cin) @ (Cin, sz) -> f32, + bias, exact GELU.
            h = jnp.dot(x_ref[...], w1_ref[:, lo:lo + sz],
                        preferred_element_type=jnp.float32)
            h = h + b1_ref[:, lo:lo + sz].astype(jnp.float32)
            h = _gelu_exact(h).astype(fc2_in_dtype)
            # fc2 partial: (TM, sz) @ (sz, Cout_p) accumulated in f32 scratch.
            part = jnp.dot(h, w2_ref[lo:lo + sz, :],
                           preferred_element_type=jnp.float32)
            if idx == 0:
                acc_ref[...] = part
            else:
                acc_ref[...] += part
        # drop1 / drop2: p=0.0 -> identity (eval semantics).
        o_ref[...] = (acc_ref[...] + b2_ref[...].astype(jnp.float32)).astype(o_ref.dtype)

    return kernel


def _vmem_limit_bytes():
    """Generation-aware scoped-VMEM limit: capacity minus headroom for Mosaic
    internal scratch/semaphores (~48 MiB usable on v7x, ~112 MiB on v5e/v6e)."""
    try:
        cap = int(pltpu.get_tpu_info().vmem_capacity_bytes)
    except Exception:
        cap = 64 * 1024 * 1024  # conservative fallback (v7x per-TC)
    return max(cap - 16 * 1024 * 1024, (cap * 3) // 4)


def _choose_tm(cin, ch_chunk, cout_p, x_item, o_item, weight_bytes, budget_bytes):
    """Largest token tile whose working set (resident single-buffered weights +
    double-buffered x/out tiles + f32 accumulator + live hidden chunk) fits."""
    avail = budget_bytes - weight_bytes - (4 << 20)  # Mosaic-internal headroom
    tm = 1024
    while tm > 8:
        per_tile = (2 * tm * cin * x_item        # x tile, double-buffered
                    + 2 * tm * cout_p * o_item   # out tile, double-buffered
                    + tm * cout_p * 4            # f32 accumulator scratch
                    + 2 * tm * ch_chunk * 4)     # live hidden chunk (f32)
        if per_tile <= avail:
            break
        tm //= 2
    # TODO(synk): if resident weights alone exceed the budget (avail <= 0),
    # stream Ch panels via a second "arbitrary" grid axis with an output
    # accumulator instead of letting TM collapse toward 8.
    return max(tm, 8)


def mlp_pallas(x2d, w1, b1, w2, b2, *, mxu_dtype=None):
    """x2d: (M, Cin); w1: (Cin, Ch); b1: (Ch,); w2: (Ch, Cout); b2: (Cout,).

    Weights are stored (in, out), i.e. pre-transposed relative to torch's
    nn.Linear.weight, so the kernel computes x @ W + b directly.
    """
    M, Cin = x2d.shape
    Ch = w1.shape[1]
    Cout = w2.shape[1]
    out_dtype = x2d.dtype

    # Optional bf16 MXU path: cast matmul operands only; accumulation, biases,
    # GELU and the final output cast stay f32 / out_dtype.
    if mxu_dtype is not None:
        x2d = x2d.astype(mxu_dtype)
        w1 = w1.astype(mxu_dtype)
        w2 = w2.astype(mxu_dtype)

    # Weight-side lane padding only (skipped entirely when dims are already
    # 128-aligned; for production, store params pre-padded to hoist this).
    ch_p = _round_up(Ch, 128)
    cout_p = _round_up(Cout, 128)

    if ch_p != Ch or cout_p != Cout:
        w2p = jnp.zeros((ch_p, cout_p), w2.dtype).at[:Ch, :Cout].set(w2)
    else:
        w2p = w2
    if ch_p != Ch:
        w1p = jnp.zeros((Cin, ch_p), w1.dtype).at[:, :Ch].set(w1)
        b1p = jnp.zeros((1, ch_p), b1.dtype).at[0, :Ch].set(b1)
    else:
        w1p, b1p = w1, b1.reshape(1, Ch)
    if cout_p != Cout:
        b2p = jnp.zeros((1, cout_p), b2.dtype).at[0, :Cout].set(b2)
    else:
        b2p = b2.reshape(1, Cout)

    # Hidden-dim chunking (static, 128-multiple slabs).
    ch_chunk = min(ch_p, 512)
    chunks = tuple((lo, min(ch_chunk, ch_p - lo)) for lo in range(0, ch_p, ch_chunk))

    # Generation-aware tile sizing.
    vmem_limit = _vmem_limit_bytes()
    w_item = jnp.dtype(w1p.dtype).itemsize
    b_item = jnp.dtype(b1p.dtype).itemsize
    x_item = jnp.dtype(x2d.dtype).itemsize
    o_item = jnp.dtype(out_dtype).itemsize
    weight_bytes = (Cin * ch_p + ch_p * cout_p) * w_item + (ch_p + cout_p) * b_item

    tm = _choose_tm(Cin, ch_chunk, cout_p, x_item, o_item, weight_bytes, vmem_limit)
    tm = min(tm, _round_up(M, 8))
    if M > 8 and pl.cdiv(M, tm) < 2:
        # Keep >=2 "parallel" M tiles so both v7x TensorCores get work.
        tm = _round_up(pl.cdiv(M, 2), 8)
    grid_m = pl.cdiv(M, tm)

    kernel = _make_mlp_kernel(chunks, w2p.dtype)

    yp = pl.pallas_call(
        kernel,
        out_shape=jax.ShapeDtypeStruct((M, cout_p), out_dtype),
        grid=(grid_m,),
        in_specs=[
            # Streamed, double-buffered token tiles (true Cin width, no pad).
            pl.BlockSpec((tm, Cin), lambda i: (i, 0)),
            # VMEM-resident, single-buffered weights & biases.
            pl.BlockSpec((Cin, ch_p), lambda i: (0, 0), pipeline_mode=pl.Buffered(1)),
            pl.BlockSpec((1, ch_p), lambda i: (0, 0), pipeline_mode=pl.Buffered(1)),
            pl.BlockSpec((ch_p, cout_p), lambda i: (0, 0), pipeline_mode=pl.Buffered(1)),
            pl.BlockSpec((1, cout_p), lambda i: (0, 0), pipeline_mode=pl.Buffered(1)),
        ],
        out_specs=pl.BlockSpec((tm, cout_p), lambda i: (i, 0)),
        scratch_shapes=[pltpu.VMEM((tm, cout_p), jnp.float32)],
        compiler_params=pltpu.CompilerParams(
            dimension_semantics=("parallel",),
            vmem_limit_bytes=vmem_limit),
    )(x2d, w1p, b1p, w2p, b2p)

    return yp if cout_p == Cout else yp[:, :Cout]


@functools.partial(jax.jit, static_argnames=("mxu_dtype",))
def mlp_forward(x_bsc, w1, b1, w2, b2, mxu_dtype=None):
    """x_bsc: (B, S, Cin) ViT-style token tensor; returns (B, S, Cout)."""
    B, S, Cin = x_bsc.shape
    Cout = w2.shape[1]
    y2d = mlp_pallas(x_bsc.reshape(B * S, Cin), w1, b1, w2, b2, mxu_dtype=mxu_dtype)
    return y2d.reshape(B, S, Cout)


if __name__ == "__main__":
    # Module config: in_features=32, hidden_features=64, out_features=32.
    B, S = 2, 8
    in_features, hidden_features, out_features = 32, 64, 32

    key = jax.random.PRNGKey(0)
    kx, kw1, kb1, kw2, kb2 = jax.random.split(key, 5)

    x = jax.random.normal(kx, (B, S, in_features), dtype=jnp.float32)

    # Params stored pre-transposed as (in, out), equivalent to torch's
    # x @ W.T with W of shape (out, in).
    w1 = jax.random.normal(kw1, (in_features, hidden_features), jnp.float32) * 0.05
    b1 = jax.random.normal(kb1, (hidden_features,), jnp.float32) * 0.05
    w2 = jax.random.normal(kw2, (hidden_features, out_features), jnp.float32) * 0.05
    b2 = jax.random.normal(kb2, (out_features,), jnp.float32) * 0.05

    y = mlp_forward(x, w1, b1, w2, b2)
    jax.block_until_ready(y)

    # Pure-JAX reference (same math: exact erf GELU, dropout p=0.0 identity).
    h_ref = x.reshape(-1, in_features) @ w1 + b1
    h_ref = 0.5 * h_ref * (1.0 + jax.lax.erf(h_ref / jnp.sqrt(2.0)))
    y_ref = (h_ref @ w2 + b2).reshape(B, S, out_features)
    assert jnp.allclose(y, y_ref, atol=1e-5, rtol=1e-5)

    print("KERNEL_OK")
</pallas_src>

<mosaic_0001>
module attributes {stable_mosaic.version = 11 : i64} {
  func.func @kernel(%arg0: i32, %arg1: memref<8x32xf32, #tpu.memory_space<vmem>>, %arg2: memref<32x128xf32, #tpu.memory_space<vmem>>, %arg3: memref<1x128xf32, #tpu.memory_space<vmem>>, %arg4: memref<128x128xf32, #tpu.memory_space<vmem>>, %arg5: memref<1x128xf32, #tpu.memory_space<vmem>>, %arg6: memref<8x128xf32, #tpu.memory_space<vmem>>, %arg7: memref<8x128xf32, #tpu.memory_space<vmem>>) attributes {dimension_semantics = [#tpu.dimension_semantics<parallel>], iteration_bounds = array<i64: 2>, scalar_prefetch = 0 : i64, scratch_operands = 1 : i64, tpu.core_type = #tpu.core_type<tc>, window_params = [{transform_indices = @transform_0, window_bounds = array<i64: 8, 32>}, {pipeline_mode = #tpu.pipeline_mode<synchronous>, transform_indices = @transform_1, window_bounds = array<i64: 32, 128>}, {pipeline_mode = #tpu.pipeline_mode<synchronous>, transform_indices = @transform_2, window_bounds = array<i64: 1, 128>}, {pipeline_mode = #tpu.pipeline_mode<synchronous>, transform_indices = @transform_3, window_bounds = array<i64: 128, 128>}, {pipeline_mode = #tpu.pipeline_mode<synchronous>, transform_indices = @transform_4, window_bounds = array<i64: 1, 128>}, {transform_indices = @transform_5, window_bounds = array<i64: 8, 128>}]} {
    %c0 = arith.constant 0 : index
    %c0_0 = arith.constant 0 : index
    %0 = vector.load %arg1[%c0, %c0_0] : memref<8x32xf32, #tpu.memory_space<vmem>>, vector<8x32xf32>
    %c0_1 = arith.constant 0 : index
    %c0_2 = arith.constant 0 : index
    %1 = vector.load %arg2[%c0_1, %c0_2] : memref<32x128xf32, #tpu.memory_space<vmem>>, vector<32x128xf32>
    %cst = arith.constant dense<0.000000e+00> : vector<8x128xf32>
    %2 = tpu.matmul %0, %1, %cst {dimension_numbers = #tpu.dot_dimension_numbers<[1], [0], [0], [1], [0, 0, 1, 1], [], []>} : vector<8x32xf32>, vector<32x128xf32>, vector<8x128xf32> -> vector<8x128xf32>
    %c0_3 = arith.constant 0 : index
    %c0_4 = arith.constant 0 : index
    %3 = vector.load %arg3[%c0_3, %c0_4] : memref<1x128xf32, #tpu.memory_space<vmem>>, vector<1x128xf32>
    %4 = vector.broadcast %3 : vector<1x128xf32> to vector<8x128xf32>
    %5 = arith.addf %2, %4 : vector<8x128xf32>
    %cst_5 = arith.constant 5.000000e-01 : f32
    %6 = vector.broadcast %cst_5 : f32 to vector<8x128xf32>
    %7 = arith.mulf %6, %5 : vector<8x128xf32>
    %cst_6 = arith.constant 0.707106769 : f32
    %8 = vector.broadcast %cst_6 : f32 to vector<8x128xf32>
    %9 = arith.mulf %5, %8 : vector<8x128xf32>
    %10 = math.erf %9 : vector<8x128xf32>
    %cst_7 = arith.constant 1.000000e+00 : f32
    %11 = vector.broadcast %cst_7 : f32 to vector<8x128xf32>
    %12 = arith.addf %11, %10 : vector<8x128xf32>
    %13 = arith.mulf %7, %12 : vector<8x128xf32>
    %c0_8 = arith.constant 0 : index
    %c0_9 = arith.constant 0 : index
    %14 = vector.load %arg4[%c0_8, %c0_9] : memref<128x128xf32, #tpu.memory_space<vmem>>, vector<128x128xf32>
    %cst_10 = arith.constant dense<0.000000e+00> : vector<8x128xf32>
    %15 = tpu.matmul %13, %14, %cst_10 {dimension_numbers = #tpu.dot_dimension_numbers<[1], [0], [0], [1], [0, 0, 1, 1], [], []>} : vector<8x128xf32>, vector<128x128xf32>, vector<8x128xf32> -> vector<8x128xf32>
    %c0_11 = arith.constant 0 : index
    %c0_12 = arith.constant 0 : index
    %16 = vector.load %arg7[%c0_11, %c0_12] : memref<8x128xf32, #tpu.memory_space<vmem>>, vector<8x128xf32>
    tpu.vector_store %arg7[%c0_11, %c0_12], %15 {strides = array<i32>} : memref<8x128xf32, #tpu.memory_space<vmem>>, vector<8x128xf32>,
    %c0_13 = arith.constant 0 : index
    %c0_14 = arith.constant 0 : index
    %17 = vector.load %arg7[%c0_13, %c0_14] : memref<8x128xf32, #tpu.memory_space<vmem>>, vector<8x128xf32>
    %c0_15 = arith.constant 0 : index
    %c0_16 = arith.constant 0 : index
    %18 = vector.load %arg5[%c0_15, %c0_16] : memref<1x128xf32, #tpu.memory_space<vmem>>, vector<1x128xf32>
    %19 = vector.broadcast %18 : vector<1x128xf32> to vector<8x128xf32>
    %20 = arith.addf %17, %19 : vector<8x128xf32>
    %c0_17 = arith.constant 0 : index
    %c0_18 = arith.constant 0 : index
    %21 = vector.load %arg6[%c0_17, %c0_18] : memref<8x128xf32, #tpu.memory_space<vmem>>, vector<8x128xf32>
    tpu.vector_store %arg6[%c0_17, %c0_18], %20 {strides = array<i32>} : memref<8x128xf32, #tpu.memory_space<vmem>>, vector<8x128xf32>,
    return
  }
  func.func @transform_0(%arg0: i32) -> (i32, i32) {
    %c0_i32 = arith.constant 0 : i32
    %c0_i32_0 = arith.constant 0 : i32
    return %arg0, %c0_i32 : i32, i32
  }
  func.func @transform_1(%arg0: i32) -> (i32, i32) {
    %c0_i32 = arith.constant 0 : i32
    %c0_i32_0 = arith.constant 0 : i32
    %c0_i32_1 = arith.constant 0 : i32
    return %c0_i32, %c0_i32_0 : i32, i32
  }
  func.func @transform_2(%arg0: i32) -> (i32, i32) {
    %c0_i32 = arith.constant 0 : i32
    %c0_i32_0 = arith.constant 0 : i32
    %c0_i32_1 = arith.constant 0 : i32
    return %c0_i32, %c0_i32_0 : i32, i32
  }
  func.func @transform_3(%arg0: i32) -> (i32, i32) {
    %c0_i32 = arith.constant 0 : i32
    %c0_i32_0 = arith.constant 0 : i32
    %c0_i32_1 = arith.constant 0 : i32
    return %c0_i32, %c0_i32_0 : i32, i32
  }
  func.func @transform_4(%arg0: i32) -> (i32, i32) {
    %c0_i32 = arith.constant 0 : i32
    %c0_i32_0 = arith.constant 0 : i32
    %c0_i32_1 = arith.constant 0 : i32
    return %c0_i32, %c0_i32_0 : i32, i32
  }
  func.func @transform_5(%arg0: i32) -> (i32, i32) {
    %c0_i32 = arith.constant 0 : i32
    %c0_i32_0 = arith.constant 0 : i32
    return %arg0, %c0_i32 : i32, i32
  }
}

</mosaic_0001>

<bundles_post_ra>
// kernel: mlp_forward.1
= control target key start
LH: loop header
LB: loop body
LE: loop exit
PB: predicated region body
PF: predicated region fallthrough
CT: control target
= control target key end

     0   :  { %s455_s18 = smov 0   ;;  %s545_s0 = inlined_call_operand.vmem [shape: f32[16,32], index: 0, kind: input, shape index: {}]   ;;  %s546_s1 = inlined_call_operand.vmem [shape: f32[32,128], index: 1, kind: input, shape index: {}]   ;;  %s547_s2 = inlined_call_operand.vmem [shape: f32[1,128], index: 2, kind: input, shape index: {}]   ;;  %s548_s3 = inlined_call_operand.vmem [shape: f32[128,128], index: 3, kind: input, shape index: {}]   ;;  %s549_s4 = inlined_call_operand.vmem [shape: f32[1,128], index: 4, kind: input, shape index: {}]   ;;  %s550_s5 = inlined_call_operand.vmem [shape: f32[16,128], index: 5, kind: output, shape index: {}]  }
   0x1 LB: > { %s394_s19 = sadd.s32 4294967295, %s423_s18   ;;  %p398_p0 = scmp.ge.s32.totalorder %s423_s18, 1  ;;  %s423_s18 = sphi %s455_s18, %s15_s18  }
   0x2   : > { %p186_p1 = scmp.lt.s32.totalorder %s423_s18, 3 }
   0x4   : > { %p187_p2 = pnand %p398_p0, %p186_p1 }
   0x5   : > { %p212_p3 = scmp.lt.s32.totalorder (!%p187_p2), %s394_s19, 1 }
   0x6   : > { %190 = sbr.rel (%p187_p2) target bundleno = 327 (0x147), region = 40 }
   0xb   : > { %v224_v0 = vld [vmem:[%s546_s1 + $0x18] sm:$0xff]  ;;  %v223_v1 = vld [vmem:[%s546_s1 + $0x10] sm:$0xff]  ;;  %v222_v2 = vld [vmem:[%s546_s1 + $0x8] sm:$0xff]  ;;  %s552_s19 = smov (!%p212_p3, %s394_s19), 1  ;;  %vm229_vm0 = vcmask 261120  }
   0xc   : > { %245 = vmatpush.msra.mxu0 %v224_v0  ;;  %v221_v3 = vld [vmem:[%s546_s1] sm:$0xff]  ;;  %s399_s28 = sshll.u32 %s552_s19, 3  ;;  %v312_v5 = vld [vmem:[%s548_s3 + $0x78] sm:$0xff]  ;;  %v311_v6 = vld [vmem:[%s548_s3 + $0x70] sm:$0xff] }
   0xd   : > { %s215_s6 = scalar_lea.vmem %s545_s0, %s399_s28  ;;  %313 = vmatpush.msra.mxu1 %v312_v5  ;;  %v310_v7 = vld [vmem:[%s548_s3 + $0x68] sm:$0xff]  ;;  %v309_v8 = vld [vmem:[%s548_s3 + $0x60] sm:$0xff]  ;;  %v308_v10 = vld [vmem:[%s548_s3 + $0x58] sm:$0xff]  ;;  %s219_s25 = scalar_lea.vmem %s550_s5, %s399_s28 }
   0xe   : > { %246 = vmatpush.msra.mxu0 %v223_v1  ;;  %v220_v4 = vld [vmem:[%s215_s6] sm:$0xff]  ;;  %v307_v11 = vld [vmem:[%s548_s3 + $0x50] sm:$0xff]  ;;  %v306_v13 = vld [vmem:[%s548_s3 + $0x48] sm:$0xff] }
   0xf   : > { %314 = vmatpush.msra.mxu1 %v311_v6  ;;  %v413_v9 = vld [vmem:[%s547_s2] ss:$0 sm:$0xff]  ;;  %v304_v17 = vld [vmem:[%s548_s3 + $0x38] sm:$0xff]  ;;  %v303_v19 = vld [vmem:[%s548_s3 + $0x30] sm:$0xff] }
  0x10   : > { %247 = vmatpush.msra.mxu0 %v222_v2  ;;  %v305_v15 = vld [vmem:[%s548_s3 + $0x40] sm:$0xff]  ;;  %v302_v21 = vld [vmem:[%s548_s3 + $0x28] sm:$0xff]  ;;  %v300_v27 = vld [vmem:[%s548_s3 + $0x18] sm:$0xff] }
  0x11   : > { %315 = vmatpush.msra.mxu1 %v310_v7  ;;  %v301_v24 = vld [vmem:[%s548_s3 + $0x20] sm:$0xff]  ;;  %v299_v30 = vld [vmem:[%s548_s3 + $0x10] sm:$0xff]  ;;  %v298_v33 = vld [vmem:[%s548_s3 + $0x8] sm:$0xff] }
  0x12   : > { %248 = vmatpush.msra.mxu0 %v221_v3  ;;  %v297_v35 = vld [vmem:[%s548_s3] sm:$0xff] }
  0x13   : > { %401 = vmatmul.msk.f32.vlgmr.msra.gmra.mxu0 %vm229_vm0, %v220_v4  ;;  %316 = vmatpush.msra.mxu1 %v309_v8  ;;  %v414_v63 = vld [vmem:[%s549_s4] ss:$0 sm:$0xff] }
  0x15   : > { %317 = vmatpush.msra.mxu1 %v308_v10 }
  0x17   : > { %318 = vmatpush.msra.mxu1 %v307_v11 }
  0x19   : > { %319 = vmatpush.msra.mxu1 %v306_v13 }
  0x1b   : > { %320 = vmatpush.msra.mxu1 %v305_v15 }
  0x1d   : > { %321 = vmatpush.msra.mxu1 %v304_v17 }
  0x1f   : > { %322 = vmatpush.msra.mxu1 %v303_v19 }
  0x21   : > { %323 = vmatpush.msra.mxu1 %v302_v21 }
  0x23   : > { %324 = vmatpush.msra.mxu1 %v301_v24 }
  0x25   : > { %325 = vmatpush.msra.mxu1 %v300_v27 }
  0x27   : > { %326 = vmatpush.msra.mxu1 %v299_v30 }
  0x29   : > { %327 = vmatpush.msra.mxu1 %v298_v33 }
  0x2b   : > { %328 = vmatpush.msra.mxu1 %v297_v35 }
  0x90   : > { %v250_v12 = vpop.f32.mrf.mxu0 }
  0x91   : > { %v251_v14 = vadd.f32 %v413_v9, %v250_v12 }
  0x93   : > { %v254_v16 = vmul.f32 0.70710677, %v251_v14  ;;  %v253_v60 = vmul.f32 0.5, %v251_v14 }
  0x95   : > { %v255_v18 = vmul.f32 %v254_v16, %v254_v16 }
  0x97   : > { %v256_v20 = vmin.f32 %v255_v18, 16.0 }
  0x99   : > { %v257_v22 = vmul.f32 2.1237322e-06, %v256_v20  ;;  %v268_v23 = vmul.f32 3.8918573e-05, %v256_v20 }
  0x9b   : > { %v258_v25 = vadd.f32 0.00028619796, %v257_v22  ;;  %v269_v26 = vadd.f32 0.001143296, %v268_v23 }
  0x9d   : > { %v259_v28 = vmul.f32 %v258_v25, %v256_v20  ;;  %v270_v29 = vmul.f32 %v269_v26, %v256_v20 }
  0x9f   : > { %v271_v31 = vadd.f32 0.014752088, %v270_v29  ;;  %v260_v32 = vadd.f32 0.0036580483, %v259_v28 }
  0xa1   : > { %v272_v34 = vmul.f32 %v271_v31, %v256_v20  ;;  %v261_v37 = vmul.f32 %v260_v32, %v256_v20 }
  0xa3   : > { %v273_v36 = vadd.f32 0.112945676, %v272_v34  ;;  %v262_v40 = vadd.f32 0.05243302, %v261_v37 }
  0xa5   : > { %v274_v38 = vmul.f32 %v273_v36, %v256_v20  ;;  %v263_v43 = vmul.f32 %v262_v40, %v256_v20 }
  0xa7   : > { %v275_v39 = vadd.f32 0.4994258, %v274_v38  ;;  %v264_v44 = vadd.f32 0.18741608, %v263_v43 }
  0xa9   : > { %v276_v41 = vmul.f32 %v275_v39, %v256_v20  ;;  %v265_v46 = vmul.f32 %v264_v44, %v256_v20 }
  0xab   : > { %v277_v42 = vadd.f32 1.0, %v276_v41  ;;  %v266_v50 = vadd.f32 1.1283791, %v265_v46 }
  0xad   : > { %415 = vrcp.f32 %v277_v42  ;;  %v289_v49 = vand.u32 2147483648, %v277_v42  ;;  %v287_v52 = vand.u32 2147483647, %v277_v42  ;;  %vm283_vm2 = vweird.f32 %v277_v42 }
  0xae   : > { %v267_v55 = vmul.f32 %v266_v50, %v254_v16 }
  0xaf   : > { %v290_v54 = vor.u32 1.1754944e-38, %v289_v49  ;;  %vm288_vm4 = vcmp.eq.f32.partialorder %v287_v52, 8.507059e+37 }
  0xb3   : > { %v416_v45 = vpop.eup %415 }
  0xb4   : > { %v279_v47 = vmul.f32 %v416_v45, %v277_v42  ;;  %vm284_vm1 = vweird.f32 %v416_v45 }
  0xb5   : > { %vm285_vm3 = vmor %vm283_vm2, %vm284_vm1 }
  0xb6   : > { %v280_v48 = vsub.f32 1.0, %v279_v47 }
  0xb8   : > { %v281_v51 = vmul.f32 %v416_v45, %v280_v48 }
  0xba   : > { %v282_v53 = vadd.f32 %v416_v45, %v281_v51 }
  0xbc   : > { %v286_v56 = vsel %vm285_vm3, %v416_v45, %v282_v53 }
  0xbd   : > { %v291_v57 = vsel %vm288_vm4, %v290_v54, %v286_v56 }
  0xbe   : > { %v292_v58 = vmul.f32 %v291_v57, %v267_v55 }
  0xc0   : > { %v402_v59 = vclamps-f32 %v292_v58, 1.0 }
  0xc2   : > { %v295_v61 = vadd.f32 1.0, %v402_v59 }
  0xc4   : > { %v296_v62 = vmul.f32 %v295_v61, %v253_v60 }
  0xc6   : > { %329 = vmatmul.f32.vlgmr.msra.gmra.mxu1 %v296_v62 }
 0x143   : > { %v330_v0 = vpop.f32.mrf.mxu1 }
 0x144   : > { %v339_v1 = vadd.f32 %v414_v63, %v330_v0 }
 0x146   : > { %340 = vst [vmem:[%s219_s25] sm:$0xff] %v339_v1 }
 0x147 PF: > { %s15_s18 = sadd.s32 1, %s423_s18  }
 0x148   : > { %p12_p4 = scmp.ge.s32.totalorder %s15_s18, 4  }
 0x14a   :  { %14 = sbr.rel (!%p12_p4) target bundleno = 1 (0x1), region = 70 }

</bundles_post_ra>
